<compile_context>
chip_gen: v7x
topology: tpu7x:2x2x1
jax: 0.10.0
libtpu: 0.0.40
codegen_flags: <defaults>
</compile_context>

<pallas_src>
import functools
import math

import jax
import jax.numpy as jnp
from jax.experimental import pallas as pl
from jax.experimental.pallas import tpu as pltpu


# --------------------------------------------------------------------------
# Pallas kernel 1: SubNet MLP over Fourier-plane coordinates (filter generator)
# Transposed layout: activations are (hidden, tile) with the coordinate axis on lanes.
# --------------------------------------------------------------------------
def _subnet_kernel(c_ref, w1t_ref, b1_ref, w2t_ref, b2_ref, w3_ref, b3_ref, o_ref):
    c = c_ref[...]                                   # (3, tile)
    w1t = w1t_ref[...]                               # (h1, 3)
    # layer 1 (3 -> h1): three broadcast multiply-adds on the VPU.
    # (If bundle profiling ever shows VALU saturated here, move this to the MXU via
    #  the ones-row bias trick; at these sizes the call is launch/DMA bound.)
    h = (w1t[:, 0:1] * c[0:1, :]
         + w1t[:, 1:2] * c[1:2, :]
         + w1t[:, 2:3] * c[2:3, :]
         + b1_ref[...])                              # (h1, tile)
    h = jnp.maximum(h, 0.01 * h)                     # LeakyReLU(0.01)
    # layer 2 (h1 -> h2): the only MXU matmul, K = h1 = 32, N = tile (lane-dense)
    h = jnp.dot(w2t_ref[...], h, preferred_element_type=jnp.float32) + b2_ref[...]
    h = jnp.maximum(h, 0.01 * h)
    # layer 3 (h2 -> 1): sublane reduction, result is a lane-dense (1, tile) row
    o_ref[...] = jnp.sum(w3_ref[...] * h, axis=0, keepdims=True) + b3_ref[...]


def subnet_apply(coords_t, params):
    """coords_t: (3, N) Fourier coordinates -> (N,) filter values."""
    w1, b1, w2, b2, w3, b3 = params                  # torch orientation: w (in, out)
    n = coords_t.shape[1]
    # Bounded lane tile (<=2048, multiple of 256) with >=4 grid steps when possible,
    # so VMEM stays flat for large images and both v7x TCs get >=2 steps each.
    tile = min(2048, max(256, ((n + 4 * 256 - 1) // (4 * 256)) * 256))
    n_pad = ((n + tile - 1) // tile) * tile
    if n_pad != n:
        coords_t = jnp.pad(coords_t, ((0, 0), (0, n_pad - n)))
    grid_n = n_pad // tile
    h1, h2 = w1.shape[1], w2.shape[1]
    out = pl.pallas_call(
        _subnet_kernel,
        out_shape=jax.ShapeDtypeStruct((1, n_pad), jnp.float32),
        grid=(grid_n,),
        in_specs=[
            pl.BlockSpec((3, tile), lambda i: (0, i)),
            pl.BlockSpec((h1, 3), lambda i: (0, 0)),
            pl.BlockSpec((h1, 1), lambda i: (0, 0)),
            pl.BlockSpec((h2, h1), lambda i: (0, 0)),
            pl.BlockSpec((h2, 1), lambda i: (0, 0)),
            pl.BlockSpec((h2, 1), lambda i: (0, 0)),
            pl.BlockSpec((1, 1), lambda i: (0, 0)),
        ],
        out_specs=pl.BlockSpec((1, tile), lambda i: (0, i)),
        compiler_params=pltpu.CompilerParams(dimension_semantics=("parallel",)),
    )(coords_t, w1.T, b1.T, w2.T, b2.T, w3, b3)
    return out[0, :n]


# --------------------------------------------------------------------------
# Pallas kernel 2: sqrt(|z|^2) + spatial mean over flattened (M, S*S) fields.
# Input is the fused squared magnitude (one fp32 array, half the bytes of re+im).
# Two variants: mod+mean (first order, |field| is re-used by the second FFT) and
# mean-only (second order, |field| never touches HBM).
# --------------------------------------------------------------------------
def _modmean_kernel(sq_ref, mod_ref, mean_ref, *, inv_area):
    mod = jnp.sqrt(sq_ref[...])                       # (tile_m, ss_pad), EUP rsqrt path
    mod_ref[...] = mod
    mean_ref[...] = jnp.sum(mod, axis=1, keepdims=True) * inv_area


def _mean_only_kernel(sq_ref, mean_ref, *, inv_area):
    mod = jnp.sqrt(sq_ref[...])
    mean_ref[...] = jnp.sum(mod, axis=1, keepdims=True) * inv_area


def _pad2(a, row_mult=8, col_mult=128):
    """Rows only need sublane (8) alignment, columns lane (128) alignment."""
    m, n = a.shape
    mp = ((m + row_mult - 1) // row_mult) * row_mult
    np_ = ((n + col_mult - 1) // col_mult) * col_mult
    if (mp, np_) != (m, n):
        a = jnp.pad(a, ((0, mp - m), (0, np_ - n)))
    return a


def _pick_tile_m(m_pad, ss_pad):
    """Rows per block.  Per-block input slab capped at ~2 MiB so the double-buffered
    working set (input + mod output, 2 buffers each ~= 4x the slab, plus tiny means)
    stays ~8 MiB: under v5e's 16 MiB default scoped-VMEM limit and well under v7x's
    64 MiB physical VMEM.  Also aims for >=4 grid steps (>=2 per v7x TensorCore) so
    the software pipeline has work to overlap; always a multiple of 8 dividing m_pad."""
    target_bytes = 2 << 20
    t_cap = max(8, (target_bytes // (ss_pad * 4)) // 8 * 8)
    t_steps = max(8, (m_pad // 4) // 8 * 8)
    t = max(8, min(t_cap, t_steps))
    while m_pad % t:
        t -= 8
    return t


def modulus_mean(sq, ss_true):
    """sq: (M, SS) squared magnitude -> (|field| (M, SS), spatial mean (M, 1))."""
    m, ss = sq.shape
    sq_p = _pad2(sq)
    m_pad, ss_pad = sq_p.shape
    tile_m = _pick_tile_m(m_pad, ss_pad)
    kern = functools.partial(_modmean_kernel, inv_area=1.0 / float(ss_true))
    mod, mean = pl.pallas_call(
        kern,
        out_shape=(
            jax.ShapeDtypeStruct((m_pad, ss_pad), jnp.float32),
            jax.ShapeDtypeStruct((m_pad, 1), jnp.float32),
        ),
        grid=(m_pad // tile_m,),
        in_specs=[pl.BlockSpec((tile_m, ss_pad), lambda i: (i, 0))],
        out_specs=(
            pl.BlockSpec((tile_m, ss_pad), lambda i: (i, 0)),
            pl.BlockSpec((tile_m, 1), lambda i: (i, 0)),
        ),
        compiler_params=pltpu.CompilerParams(dimension_semantics=("parallel",)),
    )(sq_p)
    return mod[:m, :ss], mean[:m]


def modulus_mean_only(sq, ss_true):
    """sq: (M, SS) squared magnitude -> spatial mean of |field| (M, 1)."""
    m, ss = sq.shape
    sq_p = _pad2(sq)
    m_pad, ss_pad = sq_p.shape
    tile_m = _pick_tile_m(m_pad, ss_pad)
    kern = functools.partial(_mean_only_kernel, inv_area=1.0 / float(ss_true))
    mean = pl.pallas_call(
        kern,
        out_shape=jax.ShapeDtypeStruct((m_pad, 1), jnp.float32),
        grid=(m_pad // tile_m,),
        in_specs=[pl.BlockSpec((tile_m, ss_pad), lambda i: (i, 0))],
        out_specs=pl.BlockSpec((tile_m, 1), lambda i: (i, 0)),
        compiler_params=pltpu.CompilerParams(dimension_semantics=("parallel",)),
    )(sq_p)
    return mean[:m]


def _sq_mag(c):
    """Fused |z|^2 in one XLA elementwise pass over the complex buffer."""
    re = jnp.real(c)
    im = jnp.imag(c)
    return (re * re + im * im).astype(jnp.float32)


# --------------------------------------------------------------------------
# Regressor MLP  Linear(num_outputs,128) -> ReLU -> Linear(128,1)  (plain XLA:
# K=7, B=2 is a sliver of the MXU; a Pallas call is pure launch overhead).
# --------------------------------------------------------------------------
def regressor_apply(feats, params):
    w1, b1, w2, b2 = params                          # w1 (F,H), b1 (1,H), w2 (H,1), b2 (1,1)
    h = jnp.maximum(feats @ w1 + b1, 0.0)
    return h @ w2 + b2


# --------------------------------------------------------------------------
# Glue: Fourier coordinates, FFT-based scattering, 'asymm_ang_avg' Reducer
# --------------------------------------------------------------------------
def make_filter_coords(size, num_scales, num_angles, full_rotation=True):
    """(3, num_scales*num_angles*size*size) subnet input features (transposed)."""
    k = jnp.fft.fftfreq(size) * size
    kx, ky = jnp.meshgrid(k, k, indexing="ij")
    ang_range = 2.0 * math.pi if full_rotation else math.pi
    blocks = []
    for j in range(num_scales):
        scale = 2.0 ** j
        for l in range(num_angles):
            theta = ang_range * l / num_angles
            kxr = kx * math.cos(theta) + ky * math.sin(theta)
            kyr = -kx * math.sin(theta) + ky * math.cos(theta)
            kxs = kxr * scale / size
            kys = kyr * scale / size
            kmag = jnp.sqrt(kxs * kxs + kys * kys)
            blocks.append(jnp.stack([kxs.ravel(), kys.ravel(), kmag.ravel()], axis=0))
    return jnp.concatenate(blocks, axis=1).astype(jnp.float32)


def scattering_transform(x, filters):
    """x: (B, C, S, S), filters: (J, L, S, S) real Fourier-space filters."""
    b, c, s, _ = x.shape
    ss = s * s
    j_sc, l_ang = filters.shape[:2]
    fields = x.reshape(b * c, s, s).astype(jnp.float32)

    # ---- first order -------------------------------------------------------
    xf = jnp.fft.fft2(fields)                                     # (BC, S, S) complex
    conv1 = jnp.fft.ifft2(xf[:, None, None] * filters[None])      # complex x real mult
    sq1 = _sq_mag(conv1).reshape(-1, ss)                          # (BC*J*L, SS)
    mod1_flat, mean1 = modulus_mean(sq1, ss)                      # Pallas
    mod1 = mod1_flat.reshape(b * c, j_sc, l_ang, s, s)
    s1 = mean1.reshape(b, c, j_sc, l_ang)

    # ---- second order (all j2 > j1 pairs batched into ONE kernel call) -----
    pairs = [(j1, j2) for j1 in range(j_sc) for j2 in range(j1 + 1, j_sc)]
    if pairs:
        m1f = jnp.fft.fft2(mod1)                                  # (BC, J, L, S, S)
        j1_idx = jnp.array([p[0] for p in pairs], dtype=jnp.int32)
        j2_idx = jnp.array([p[1] for p in pairs], dtype=jnp.int32)
        m1_sel = jnp.take(m1f, j1_idx, axis=1)                    # (BC, P, L, S, S)
        f_sel = jnp.take(filters, j2_idx, axis=0)                 # (P, L, S, S) real
        conv2 = jnp.fft.ifft2(
            m1_sel[:, :, :, None, :, :] * f_sel[None, :, None, :, :, :]
        )                                                         # (BC, P, L, L, S, S)
        sq2 = _sq_mag(conv2).reshape(-1, ss)
        mean2 = modulus_mean_only(sq2, ss)                        # Pallas, no mod HBM write
        s2 = mean2.reshape(b, c, len(pairs), l_ang, l_ang)
    else:
        s2 = jnp.zeros((b, c, 0, l_ang, l_ang), jnp.float32)

    s0 = jnp.mean(fields, axis=(1, 2)).reshape(b, c)
    return s0, s1, s2


def reduce_asymm_ang_avg(s0, s1, s2):
    """S0 + angle-averaged S1 + angle-averaged S2 (j2 > j1) -> (B, C, num_outputs)."""
    parts = [s0[..., None], jnp.mean(s1, axis=-1), jnp.mean(s2, axis=(-2, -1))]
    return jnp.concatenate(parts, axis=-1)


def nfst_forward(params, x):
    """Equivalent of NFSTRegressor.forward; x: (B, 1, S, S) -> (B, 1)."""
    j_sc = params["num_scales"]
    l_ang = params["num_angles"]
    s = x.shape[-1]
    # self.filters.update_filters()
    filters = subnet_apply(params["coords"], params["subnet"]).reshape(j_sc, l_ang, s, s)
    # x = self.st(x)
    s0, s1, s2 = scattering_transform(x, filters)
    # x = self.reducer(x).squeeze(1)
    feats = reduce_asymm_ang_avg(s0, s1, s2)[:, 0, :]
    # return self.regressor(x)
    return regressor_apply(feats, params["regressor"])


# --------------------------------------------------------------------------
# Deterministic parameter construction (torch.nn.Linear-style uniform init)
# --------------------------------------------------------------------------
def init_params(key, size, num_scales, num_angles=4, subnet_hidden=(32, 32),
                linear_hiddens=128):
    keys = jax.random.split(key, 5)

    def linear(kk, fan_in, fan_out):
        kw, kb = jax.random.split(kk)
        bound = 1.0 / math.sqrt(fan_in)
        w = jax.random.uniform(kw, (fan_in, fan_out), jnp.float32, -bound, bound)
        b = jax.random.uniform(kb, (1, fan_out), jnp.float32, -bound, bound)
        return w, b

    w1, b1 = linear(keys[0], 3, subnet_hidden[0])
    w2, b2 = linear(keys[1], subnet_hidden[0], subnet_hidden[1])
    w3, b3 = linear(keys[2], subnet_hidden[1], 1)

    num_outputs = 1 + num_scales + num_scales * (num_scales - 1) // 2
    rw1, rb1 = linear(keys[3], num_outputs, linear_hiddens)
    rw2, rb2 = linear(keys[4], linear_hiddens, 1)

    return {
        "subnet": (w1, b1, w2, b2, w3, b3),
        "regressor": (rw1, rb1, rw2, rb2),
        "coords": make_filter_coords(size, num_scales, num_angles, full_rotation=True),
        "num_scales": num_scales,
        "num_angles": num_angles,
        "num_outputs": num_outputs,
    }


if __name__ == "__main__":
    batch, size, num_scales, num_angles = 2, 16, 3, 4
    key = jax.random.PRNGKey(0)
    kp, kx = jax.random.split(key)
    params = init_params(kp, size, num_scales, num_angles)
    x = jax.random.normal(kx, (batch, 1, size, size), jnp.float32)

    out = nfst_forward(params, x)
    out = jax.block_until_ready(out)

    assert out.shape == (batch, 1), out.shape
    assert bool(jnp.all(jnp.isfinite(out)))
    print("KERNEL_OK")
</pallas_src>

<mosaic_0001>
module attributes {stable_mosaic.version = 11 : i64} {
  func.func @_subnet_kernel(%arg0: i32, %arg1: memref<3x768xf32, #tpu.memory_space<vmem>>, %arg2: memref<32x3xf32, #tpu.memory_space<vmem>>, %arg3: memref<32x1xf32, #tpu.memory_space<vmem>>, %arg4: memref<32x32xf32, #tpu.memory_space<vmem>>, %arg5: memref<32x1xf32, #tpu.memory_space<vmem>>, %arg6: memref<32x1xf32, #tpu.memory_space<vmem>>, %arg7: memref<1x1xf32, #tpu.memory_space<vmem>>, %arg8: memref<1x768xf32, #tpu.memory_space<vmem>>) attributes {dimension_semantics = [#tpu.dimension_semantics<parallel>], iteration_bounds = array<i64: 4>, scalar_prefetch = 0 : i64, scratch_operands = 0 : i64, tpu.core_type = #tpu.core_type<tc>, window_params = [{transform_indices = @transform_0, window_bounds = array<i64: 3, 768>}, {pipeline_mode = #tpu.pipeline_mode<synchronous>, transform_indices = @transform_1, window_bounds = array<i64: 32, 3>}, {pipeline_mode = #tpu.pipeline_mode<synchronous>, transform_indices = @transform_2, window_bounds = array<i64: 32, 1>}, {pipeline_mode = #tpu.pipeline_mode<synchronous>, transform_indices = @transform_3, window_bounds = array<i64: 32, 32>}, {pipeline_mode = #tpu.pipeline_mode<synchronous>, transform_indices = @transform_4, window_bounds = array<i64: 32, 1>}, {pipeline_mode = #tpu.pipeline_mode<synchronous>, transform_indices = @transform_5, window_bounds = array<i64: 32, 1>}, {pipeline_mode = #tpu.pipeline_mode<synchronous>, transform_indices = @transform_6, window_bounds = array<i64: 1, 1>}, {transform_indices = @transform_7, window_bounds = array<i64: 1, 768>}]} {
    %c0 = arith.constant 0 : index
    %c0_0 = arith.constant 0 : index
    %0 = vector.load %arg1[%c0, %c0_0] : memref<3x768xf32, #tpu.memory_space<vmem>>, vector<3x768xf32>
    %c0_1 = arith.constant 0 : index
    %c0_2 = arith.constant 0 : index
    %1 = vector.load %arg2[%c0_1, %c0_2] : memref<32x3xf32, #tpu.memory_space<vmem>>, vector<32x3xf32>
    %2 = vector.extract_strided_slice %1 {offsets = [0, 0], sizes = [32, 1], strides = [1, 1]} : vector<32x3xf32> to vector<32x1xf32>
    %3 = vector.extract_strided_slice %0 {offsets = [0, 0], sizes = [1, 768], strides = [1, 1]} : vector<3x768xf32> to vector<1x768xf32>
    %4 = vector.broadcast %2 : vector<32x1xf32> to vector<32x768xf32>
    %5 = vector.broadcast %3 : vector<1x768xf32> to vector<32x768xf32>
    %6 = arith.mulf %4, %5 : vector<32x768xf32>
    %7 = vector.extract_strided_slice %1 {offsets = [0, 1], sizes = [32, 1], strides = [1, 1]} : vector<32x3xf32> to vector<32x1xf32>
    %8 = vector.extract_strided_slice %0 {offsets = [1, 0], sizes = [1, 768], strides = [1, 1]} : vector<3x768xf32> to vector<1x768xf32>
    %9 = vector.broadcast %7 : vector<32x1xf32> to vector<32x768xf32>
    %10 = vector.broadcast %8 : vector<1x768xf32> to vector<32x768xf32>
    %11 = arith.mulf %9, %10 : vector<32x768xf32>
    %12 = arith.addf %6, %11 : vector<32x768xf32>
    %13 = vector.extract_strided_slice %1 {offsets = [0, 2], sizes = [32, 1], strides = [1, 1]} : vector<32x3xf32> to vector<32x1xf32>
    %14 = vector.extract_strided_slice %0 {offsets = [2, 0], sizes = [1, 768], strides = [1, 1]} : vector<3x768xf32> to vector<1x768xf32>
    %15 = vector.broadcast %13 : vector<32x1xf32> to vector<32x768xf32>
    %16 = vector.broadcast %14 : vector<1x768xf32> to vector<32x768xf32>
    %17 = arith.mulf %15, %16 : vector<32x768xf32>
    %18 = arith.addf %12, %17 : vector<32x768xf32>
    %c0_3 = arith.constant 0 : index
    %c0_4 = arith.constant 0 : index
    %19 = vector.load %arg3[%c0_3, %c0_4] : memref<32x1xf32, #tpu.memory_space<vmem>>, vector<32x1xf32>
    %20 = vector.broadcast %19 : vector<32x1xf32> to vector<32x768xf32>
    %21 = arith.addf %18, %20 : vector<32x768xf32>
    %cst = arith.constant 0.00999999977 : f32
    %22 = vector.broadcast %cst : f32 to vector<32x768xf32>
    %23 = arith.mulf %22, %21 : vector<32x768xf32>
    %24 = arith.maximumf %21, %23 : vector<32x768xf32>
    %c0_5 = arith.constant 0 : index
    %c0_6 = arith.constant 0 : index
    %25 = vector.load %arg4[%c0_5, %c0_6] : memref<32x32xf32, #tpu.memory_space<vmem>>, vector<32x32xf32>
    %cst_7 = arith.constant dense<0.000000e+00> : vector<32x768xf32>
    %26 = tpu.matmul %25, %24, %cst_7 {dimension_numbers = #tpu.dot_dimension_numbers<[1], [0], [0], [1], [0, 0, 1, 1], [], []>} : vector<32x32xf32>, vector<32x768xf32>, vector<32x768xf32> -> vector<32x768xf32>
    %c0_8 = arith.constant 0 : index
    %c0_9 = arith.constant 0 : index
    %27 = vector.load %arg5[%c0_8, %c0_9] : memref<32x1xf32, #tpu.memory_space<vmem>>, vector<32x1xf32>
    %28 = vector.broadcast %27 : vector<32x1xf32> to vector<32x768xf32>
    %29 = arith.addf %26, %28 : vector<32x768xf32>
    %cst_10 = arith.constant 0.00999999977 : f32
    %30 = vector.broadcast %cst_10 : f32 to vector<32x768xf32>
    %31 = arith.mulf %30, %29 : vector<32x768xf32>
    %32 = arith.maximumf %29, %31 : vector<32x768xf32>
    %c0_11 = arith.constant 0 : index
    %c0_12 = arith.constant 0 : index
    %33 = vector.load %arg6[%c0_11, %c0_12] : memref<32x1xf32, #tpu.memory_space<vmem>>, vector<32x1xf32>
    %34 = vector.broadcast %33 : vector<32x1xf32> to vector<32x768xf32>
    %35 = arith.mulf %34, %32 : vector<32x768xf32>
    %cst_13 = arith.constant dense<0.000000e+00> : vector<768xf32>
    %36 = vector.multi_reduction <add>, %35, %cst_13 [0] : vector<32x768xf32> to vector<768xf32>
    %37 = vector.shape_cast %36 : vector<768xf32> to vector<1x768xf32>
    %c0_14 = arith.constant 0 : index
    %c0_15 = arith.constant 0 : index
    %38 = vector.load %arg7[%c0_14, %c0_15] : memref<1x1xf32, #tpu.memory_space<vmem>>, vector<1x1xf32>
    %39 = vector.broadcast %38 : vector<1x1xf32> to vector<1x768xf32>
    %40 = arith.addf %37, %39 : vector<1x768xf32>
    %c0_16 = arith.constant 0 : index
    %c0_17 = arith.constant 0 : index
    %41 = vector.load %arg8[%c0_16, %c0_17] : memref<1x768xf32, #tpu.memory_space<vmem>>, vector<1x768xf32>
    tpu.vector_store %arg8[%c0_16, %c0_17], %40 {strides = array<i32>} : memref<1x768xf32, #tpu.memory_space<vmem>>, vector<1x768xf32>,
    return
  }
  func.func @transform_0(%arg0: i32) -> (i32, i32) {
    %c0_i32 = arith.constant 0 : i32
    %c0_i32_0 = arith.constant 0 : i32
    return %c0_i32, %arg0 : i32, i32
  }
  func.func @transform_1(%arg0: i32) -> (i32, i32) {
    %c0_i32 = arith.constant 0 : i32
    %c0_i32_0 = arith.constant 0 : i32
    %c0_i32_1 = arith.constant 0 : i32
    return %c0_i32, %c0_i32_0 : i32, i32
  }
  func.func @transform_2(%arg0: i32) -> (i32, i32) {
    %c0_i32 = arith.constant 0 : i32
    %c0_i32_0 = arith.constant 0 : i32
    %c0_i32_1 = arith.constant 0 : i32
    return %c0_i32, %c0_i32_0 : i32, i32
  }
  func.func @transform_3(%arg0: i32) -> (i32, i32) {
    %c0_i32 = arith.constant 0 : i32
    %c0_i32_0 = arith.constant 0 : i32
    %c0_i32_1 = arith.constant 0 : i32
    return %c0_i32, %c0_i32_0 : i32, i32
  }
  func.func @transform_4(%arg0: i32) -> (i32, i32) {
    %c0_i32 = arith.constant 0 : i32
    %c0_i32_0 = arith.constant 0 : i32
    %c0_i32_1 = arith.constant 0 : i32
    return %c0_i32, %c0_i32_0 : i32, i32
  }
  func.func @transform_5(%arg0: i32) -> (i32, i32) {
    %c0_i32 = arith.constant 0 : i32
    %c0_i32_0 = arith.constant 0 : i32
    %c0_i32_1 = arith.constant 0 : i32
    return %c0_i32, %c0_i32_0 : i32, i32
  }
  func.func @transform_6(%arg0: i32) -> (i32, i32) {
    %c0_i32 = arith.constant 0 : i32
    %c0_i32_0 = arith.constant 0 : i32
    %c0_i32_1 = arith.constant 0 : i32
    return %c0_i32, %c0_i32_0 : i32, i32
  }
  func.func @transform_7(%arg0: i32) -> (i32, i32) {
    %c0_i32 = arith.constant 0 : i32
    %c0_i32_0 = arith.constant 0 : i32
    return %c0_i32, %arg0 : i32, i32
  }
}

</mosaic_0001>

<bundles_post_ra>
// kernel: tpu_custom_call.1
= control target key start
LH: loop header
LB: loop body
LE: loop exit
PB: predicated region body
PF: predicated region fallthrough
CT: control target
= control target key end

     0   :  { %s2062_s0 = inlined_call_operand.vmem [shape: f32[3,3072], index: 0, kind: input, shape index: {}]   ;;  %s2063_s1 = inlined_call_operand.vmem [shape: f32[32,3], index: 1, kind: input, shape index: {}]   ;;  %s2064_s2 = inlined_call_operand.vmem [shape: f32[32,1], index: 2, kind: input, shape index: {}]   ;;  %s2065_s3 = inlined_call_operand.vmem [shape: f32[32,32], index: 3, kind: input, shape index: {}]   ;;  %s2066_s4 = inlined_call_operand.vmem [shape: f32[32,1], index: 4, kind: input, shape index: {}]   ;;  %s2067_s5 = inlined_call_operand.vmem [shape: f32[32,1], index: 5, kind: input, shape index: {}]   ;;  %s2068_s6 = inlined_call_operand.<no memory space> [shape: f32[1,1], index: 6, kind: input, shape index: {}]   ;;  %s2069_s7 = inlined_call_operand.hbm [shape: f32[1,3072], index: 7, kind: output, shape index: {}]  }
   0x1   :  { %v12_v0 = vstv %s2068_s6 }
   0x2   :  { %13 = vst [vmem:[#allocation2] sm:$0x1] %v12_v0 }
   0x3   :  { %14 = vsyncpa [#allocation4], 0 }
   0x4   :  { %16 = vsyncpa [#allocation4 + $0x1], 0  ;;  %s1537_s26 = smov 0   ;;  %s1539_s27 = smov 0  }
   0x5   :  { %s1541_s28 = smov 0   ;;  %s1543_s29 = smov 0  }
   0x6 LB: > { %s1558_s6 = sadd.s32 4294967295, %s1486_s29   ;;  %s1322_s30 = sadd.s32 4294967294, %s1486_s29   ;;  %s1486_s29 = sphi %s1543_s29, %s2106_s29   ;;  %s1482_s28 = sphi %s1541_s28, %s2105_s28   ;;  %s1478_s27 = sphi %s1539_s27, %s2104_s27   ;;  %s1474_s26 = sphi %s1537_s26, %s2103_s26  }
   0x7   : > { %s1562_s8 = sadd.s32 1, %s1486_s29   ;;  %s181_s9 = sadd.s32 1, %s1482_s28 }
   0x8   : > { %s178_s10 = ssub.s32 %s1486_s29, %s1562_s8  ;;  %p191_p0 = scmp.ne.s32.totalorder %s1482_s28, %s1478_s27 }
   0x9   : > { %p179_p1 = scmp.eq.s32.totalorder %s178_s10, 0  ;;  %p192_p2 = scmp.eq.s32.totalorder %s1558_s6, 3 }
   0xa   : > { %p197_p3 = scmp.ne.s32.totalorder %s1478_s27, %s1474_s26  ;;  %p198_p4 = scmp.eq.s32.totalorder %s1322_s30, 3 }
   0xb   : > { %s1573_s11 = scalar_select %p179_p1, %s1482_s28, %s181_s9  }
   0xc   : > { %p1575_p5 = por %p192_p2, %p191_p0  ;;  %p1579_p6 = por %p198_p4, %p197_p3 }
   0xd   : > { %p1325_p7 = scmp.ge.s32.totalorder %s1486_s29, 1  ;;  %p243_p8 = scmp.lt.s32.totalorder %s1486_s29, 5 }
   0xf   : > { %p244_p9 = pnand %p1325_p7, %p243_p8 }
  0x11   : > { %247 = sbr.rel (%p244_p9) target bundleno = 494 (0x1ee), region = 48 }
  0x18   : > { %v285_v1 = vld [vmem:[%s2063_s1] sm:$0xff]  ;;  %v1488_v2 = vmov 2   ;;  %v1489_v3 = vmov 1   ;;  %v287_v4 = vld [vmem:[%s2063_s1 + $0x10] sm:$0xff]  ;;  %v286_v5 = vld [vmem:[%s2063_s1 + $0x8] sm:$0xff]  ;;  %v1490_v6 = vmov 0   ;;  %v2070_v22 = vlaneseq }
  0x19   : > { %1417 = vset.pattern.permute.xlu0 %v1488_v2  ;;  %1416 = vset.pattern.permute.xlu1 %v1489_v3  ;;  %v288_v7 = vld [vmem:[%s2063_s1 + $0x18] sm:$0xff]  ;;  %v627_v8 = vld [vmem:[%s2064_s2 + $0x8] sm:$0xff]  ;;  %v726_v9 = vld [vmem:[%s2066_s4] sm:$0xff]  ;;  %v2071_v20 = vmov 0.0   ;;  %s275_s16 = smul.u32 6, %s1558_s6  ;;  %vm750_vm0 = vcmask 261120  }
  0x1a   : > { %509 = vperm.xlu0 %1417, %v285_v1   ;;  %391 = vperm.xlu1 %1416, %v285_v1   ;;  %v728_v10 = vld [vmem:[%s2066_s4 + $0x10] sm:$0xff]  ;;  %v1078_v11 = vld [vmem:[%s2067_s5] sm:$0xff]  ;;  %v629_v16 = vld [vmem:[%s2064_s2 + $0x18] sm:$0xff]  ;;  %v1637_v23 = vshrl.u32 %v2070_v22, 7  ;;  %s272_s14 = sand.u32 1, %s1478_s27   ;;  %s1493_s23 = smov [#allocation3]  }
  0x1b   : > { %v626_v12 = vld [vmem:[%s2064_s2] sm:$0xff]  ;;  %v1080_v13 = vld [vmem:[%s2067_s5 + $0x10] sm:$0xff]  ;;  %v727_v17 = vld [vmem:[%s2066_s4 + $0x8] sm:$0xff]  ;;  %827 = vmatprep.mubr.f32.mxu0 %v2071_v20  ;;  %839 = vmatprep.mubr.f32.mxu1 %v2071_v20  ;;  %p276_p10 = scmp.lt.s32.totalorder %s275_s16, 23  ;;  %s1371_s15 = smul.u32 6, %s272_s14 }
  0x1c   : > { %v628_v14 = vld [vmem:[%s2064_s2 + $0x10] sm:$0xff]  ;;  %v1180_v15 = vld [vmem:[#allocation2] sm:$0x1]  ;;  %v729_v18 = vld [vmem:[%s2066_s4 + $0x18] sm:$0xff]  ;;  %2077 = vst [vmem:[#allocation6_spill] sm:$0xff] %v1637_v23  ;;  %v408_v24 = vsub.s32 1, %v1637_v23 }
  0x1d   : > { %v1079_v19 = vld [vmem:[%s2067_s5 + $0x8] sm:$0xff]  ;;  %v1081_v21 = vld [vmem:[%s2067_s5 + $0x18] sm:$0xff]  ;;  %s2108_s16 = smov (!%p276_p10, %s275_s16), 23  ;;  %v412_v25 = vsub.s32 5, %v1637_v23  ;;  %v526_v27 = vsub.s32 2, %v1637_v23  ;;  %v530_v31 = vsub.s32 6, %v1637_v23 }
  0x1e   : > { %517 = vperm.xlu0 %1417, %v287_v4   ;;  %395 = vperm.xlu1 %1416, %v286_v5   ;;  %s1326_s17 = sshll.u32 %s2108_s16, 2  ;;  %v1647_v33 = vsub.s32 0, %v1637_v23  ;;  %v318_v34 = vsub.s32 4, %v1637_v23  ;;  %s1342_s16 = smul.u32 96, %s1558_s6 }
  0x1f   : > { %s279_s20 = scalar_lea.vmem %s2062_s0, %s1326_s17  ;;  %s274_s17 = scalar_lea.vmem [#allocation3], %s1371_s15 }
  0x20   : > { %v283_v26 = vld [vmem:[%s279_s20 + $0x8] sm:$0x77]  ;;  %v284_v28 = vld [vmem:[%s279_s20 + $0x10] sm:$0x77]  ;;  %v282_v32 = vld [vmem:[%s279_s20] sm:$0x77]  ;;  %s2020_s21 = scalar_lea.hbm %s2069_s7, %s1342_s16 }
  0x21   : > { %v417_v29 = vrot.slane %v283_v26, %v408_v24  ;;  %v421_v30 = vrot.slane %v283_v26, %v412_v25  ;;  %2078 = vst [vmem:[#allocation7_spill] sm:$0xff] %v1647_v33  ;;  %v425_v35 = vrot.slane %v284_v28, %v408_v24  ;;  %v429_v36 = vrot.slane %v284_v28, %v412_v25  ;;  %s1263_s18 = sshll.u32 %s274_s17, 4  ;;  %s1249_s22 = scalar_lea.sflag [#allocation4], %s272_s14  ;;  %s2022_s18 = int_to_ptr.vmem [resolvable:$true] %s1263_s18 }
  0x22   : > { %1421 = vset.pattern.permute.xlu0 %v1490_v6  ;;  %1418 = vset.pattern.permute.xlu1 %v1488_v2  ;;  %v535_v37 = vrot.slane %v283_v26, %v526_v27  ;;  %v539_v40 = vrot.slane %v283_v26, %v530_v31  ;;  %v543_v41 = vrot.slane %v284_v28, %v526_v27  ;;  %s1424_s6 = scalar_lea.vmem %s2022_s18, 96  ;;  %s1428_s24 = sshll.u32 %s1493_s23, 4  ;;  %s1429_s24 = int_to_ptr.vmem [resolvable:$false] %s1428_s24 }
  0x23   : > { %291 = vperm.xlu0 %1421, %v285_v1   ;;  %513 = vperm.xlu1 %1418, %v286_v5   ;;  %v1650_v38 = vrot.slane %v417_v29, %v408_v24  ;;  %v1652_v39 = vrot.slane %v421_v30, %v408_v24  ;;  %v547_v42 = vrot.slane %v284_v28, %v530_v31  ;;  %p1425_p11 = scmp.ne.s32.totalorder %s2022_s18, %s1424_s6  ;;  %s1430_s25 = scalar_lea.vmem %s1429_s24, 192 }
  0x24   : > { %v527_v43 = vrot.slane %v282_v32, %v526_v27  ;;  %v531_v44 = vrot.slane %v282_v32, %v530_v31  ;;  %v413_v45 = vrot.slane %v282_v32, %v412_v25  ;;  %v323_v46 = vrot.slane %v283_v26, %v1647_v33  ;;  %p1431_p0 = scmp.lt.s32.totalorder %s2022_s18, %s1429_s24  ;;  %p1432_p1 = scmp.lt.s32.totalorder %s1430_s25, %s1424_s6 }
  0x25   : > { %v327_v47 = vrot.slane %v283_v26, %v318_v34  ;;  %v331_v48 = vrot.slane %v284_v28, %v1647_v33  ;;  %v409_v49 = vrot.slane %v282_v32, %v408_v24  ;;  %v1656_v51 = vrot.slane %v425_v35, %v408_v24  ;;  %p1426_p12 = pnand %p1425_p11, %p1575_p5 }
  0x26   : > { %v335_v53 = vrot.slane %v284_v28, %v318_v34  ;;  %v315_v54 = vrot.slane %v282_v32, %v1647_v33  ;;  %v319_v55 = vrot.slane %v282_v32, %v318_v34  ;;  %v1659_v56 = vrot.slane %v429_v36, %v408_v24  ;;  %p1433_p2 = por %p1432_p1, %p1431_p0 }
  0x27   : > { %296 = vperm.xlu0 %1421, %v286_v5   ;;  %1419 = vset.pattern.permute.xlu1 %v1490_v6  ;;  %v1661_v57 = vrot.slane %v535_v37, %v526_v27  ;;  %v1663_v58 = vrot.slane %v539_v40, %v526_v27  ;;  %v1665_v59 = vrot.slane %v543_v41, %v526_v27  ;;  %p1427_p13 = pneg %p1426_p12 }
  0x28   : > { %301 = vperm.xlu1 %1419, %v287_v4   ;;  %v1667_v60 = vrot.slane %v547_v42, %v526_v27  ;;  %v1669_v61 = vrot.slane %v527_v43, %v526_v27  ;;  %v1671_v62 = vrot.slane %v531_v44, %v526_v27  ;;  %v1673_v63 = vrot.slane %v413_v45, %v408_v24 }
  0x29   : > { %v1676_v0 = vrot.slane %v323_v46, %v1647_v33  ;;  %v1679_v1 = vrot.slane %v327_v47, %v1647_v33  ;;  %p1434_p3 = pnand %p1433_p2, %p1427_p13 }
  0x2b   : > { %306 = vperm.xlu0 %1421, %v288_v7  }
  0x2c   : > { %1420 = vset.pattern.permute.xlu1 %v1489_v3  ;;  %v1684_v3 = vrot.slane %v409_v49, %v408_v24 }
  0x2d   : > { %399 = vperm.xlu1 %1420, %v287_v4  }
  0x2f   : > { %637 = vperm.xlu0 %1421, %v627_v8   ;;  %v345_v8 = vrot.slane %v315_v54, %v1647_v33 }
  0x31   : > { %403 = vperm.xlu1 %1420, %v288_v7  }
  0x33   : > { %732 = vperm.xlu0 %1421, %v726_v9   ;;  %v349_v9 = vrot.slane %v319_v55, %v1647_v33 }
  0x35   : > { %1422 = vset.pattern.permute.xlu1 %v1488_v2  ;;  %v1682_v2 = vrot.slane %v331_v48, %v1647_v33 }
  0x36   : > { %521 = vperm.xlu1 %1422, %v288_v7   ;;  %v1688_v7 = vrot.slane %v335_v53, %v1647_v33 }
  0x37   : > { %742 = vperm.xlu0 %1421, %v728_v10  }
  0x3a   : > { %1423 = vset.pattern.permute.xlu1 %v1490_v6 }
  0x3b   : > { %1084 = vperm.xlu0 %1421, %v1078_v11   ;;  %632 = vperm.xlu1 %1423, %v626_v12  }
  0x3f   : > { %1094 = vperm.xlu0 %1421, %v1080_v13   ;;  %642 = vperm.xlu1 %1423, %v628_v14  }
  0x43   : > { %1183 = vperm.xlu0 %1421, %v1180_v15   ;;  %647 = vperm.xlu1 %1423, %v629_v16  }
  0x47   : > { %737 = vperm.xlu1 %1423, %v727_v17  }
  0x4b   : > { %747 = vperm.xlu1 %1423, %v729_v18  }
  0x4f   : > { %1089 = vperm.xlu1 %1423, %v1079_v19  }
  0x53   : > { %1099 = vperm.xlu1 %1423, %v1081_v21  }
  0x99   : > { %v392_v50 = vpop.permute.xlu1 %391  ;;  %v510_v52 = vpop.permute.xlu0 %509 }
  0x9a   : > { %v462_v4 = vmul.f32 %v1650_v38, %v392_v50  ;;  %v463_v10 = vmul.f32 %v1652_v39, %v392_v50  ;;  %v464_v11 = vmul.f32 %v1656_v51, %v392_v50  ;;  %v465_v12 = vmul.f32 %v1659_v56, %v392_v50 }
  0x9b   : > { %v1696_v13 = vmul.f32 %v1661_v57, %v510_v52  ;;  %v1699_v14 = vmul.f32 %v1663_v58, %v510_v52  ;;  %v1702_v15 = vmul.f32 %v1665_v59, %v510_v52  ;;  %v1705_v16 = vmul.f32 %v1667_v60, %v510_v52 }
  0x9c   : > { %v461_v17 = vmul.f32 %v1673_v63, %v392_v50  ;;  %v1710_v19 = vmul.f32 %v1671_v62, %v510_v52  ;;  %v460_v21 = vmul.f32 %v1684_v3, %v392_v50  ;;  %v1714_v24 = vmul.f32 %v1669_v61, %v510_v52 }
  0x9d   : > { %v396_v5 = vpop.permute.xlu1 %395  ;;  %v518_v6 = vpop.permute.xlu0 %517  ;;  %2079 = vst [vmem:[#allocation8_spill] sm:$0xff] %v1702_v15 }
  0x9e   : > { %v468_v18 = vmul.f32 %v1650_v38, %v396_v5  ;;  %v1717_v25 = vmul.f32 %v1652_v39, %v396_v5  ;;  %v470_v26 = vmul.f32 %v1656_v51, %v396_v5  ;;  %v1721_v27 = vmul.f32 %v1659_v56, %v396_v5 }
  0x9f   : > { %v1724_v28 = vmul.f32 %v1669_v61, %v518_v6  ;;  %v1727_v29 = vmul.f32 %v1671_v62, %v518_v6  ;;  %v1730_v30 = vmul.f32 %v1661_v57, %v518_v6  ;;  %v1733_v31 = vmul.f32 %v1663_v58, %v518_v6 }
  0xa0   : > { %v1736_v32 = vmul.f32 %v1665_v59, %v518_v6  ;;  %v1739_v36 = vmul.f32 %v1667_v60, %v518_v6  ;;  %v467_v44 = vmul.f32 %v1673_v63, %v396_v5  ;;  %v466_v45 = vmul.f32 %v1684_v3, %v396_v5 }
  0xa1   : > { %2080 = vst [vmem:[#allocation9_spill] sm:$0xff] %v1730_v30  ;;  %2081 = vst [vmem:[#allocation10_spill] sm:$0xff] %v1733_v31 }
  0xa2   : > { %2082 = vst [vmem:[#allocation11_spill] sm:$0xff] %v1736_v32  ;;  %v292_v34 = vpop.permute.xlu0 %291  ;;  %v514_v35 = vpop.permute.xlu1 %513  ;;  %2083 = vst [vmem:[#allocation12_spill] sm:$0xff] %v1739_v36 }
  0xa3   : > { %v368_v37 = vmul.f32 %v1676_v0, %v292_v34  ;;  %v369_v40 = vmul.f32 %v1679_v1, %v292_v34  ;;  %v370_v41 = vmul.f32 %v1682_v2, %v292_v34  ;;  %v371_v42 = vmul.f32 %v1688_v7, %v292_v34 }
  0xa4   : > { %v1746_v43 = vmul.f32 %v1661_v57, %v514_v35  ;;  %v1753_v47 = vmul.f32 %v1663_v58, %v514_v35  ;;  %v1756_v48 = vmul.f32 %v1665_v59, %v514_v35  ;;  %v1759_v49 = vmul.f32 %v1667_v60, %v514_v35 }
  0xa5   : > { %v1750_v46 = vadd.f32 %v462_v4, %v368_v37  ;;  %v1761_v50 = vadd.f32 %v464_v11, %v370_v41  ;;  %v367_v53 = vmul.f32 %v349_v9, %v292_v34  ;;  %v585_v54 = vmul.f32 %v1671_v62, %v514_v35 }
  0xa6   : > { %2084 = vst [vmem:[#allocation13_spill] sm:$0xff] %v1756_v48  ;;  %v297_v52 = vpop.permute.xlu0 %296  ;;  %v366_v55 = vmul.f32 %v345_v8, %v292_v34  ;;  %v584_v37 = vmul.f32 %v1669_v61, %v514_v35  ;;  %v1767_v22 = vadd.f32 %v463_v10, %v369_v40  ;;  %v1771_v41 = vadd.f32 %v465_v12, %v371_v42 }
  0xa7   : > { %2085 = vst [vmem:[#allocation14_spill] sm:$0xff] %v1761_v50  ;;  %v374_v5 = vmul.f32 %v1676_v0, %v297_v52  ;;  %v376_v4 = vmul.f32 %v1682_v2, %v297_v52  ;;  %v302_v6 = vpop.permute.xlu1 %301  ;;  %v375_v20 = vmul.f32 %v1679_v1, %v297_v52  ;;  %v377_v23 = vmul.f32 %v1688_v7, %v297_v52 }
  0xa8   : > { %v378_v11 = vmul.f32 %v345_v8, %v302_v6  ;;  %v379_v32 = vmul.f32 %v349_v9, %v302_v6  ;;  %v380_v34 = vmul.f32 %v1676_v0, %v302_v6  ;;  %v1777_v30 = vmul.f32 %v1679_v1, %v302_v6 }
  0xa9   : > { %v1773_v33 = vadd.f32 %v468_v18, %v374_v5  ;;  %v1779_v36 = vadd.f32 %v470_v26, %v376_v4  ;;  %v373_v10 = vmul.f32 %v349_v9, %v297_v52  ;;  %v485_v40 = vadd.f32 %v461_v17, %v367_v53 }
  0xaa   : > { %2086 = vst [vmem:[#allocation15_spill] sm:$0xff] %v1777_v30  ;;  %v307_v35 = vpop.permute.xlu0 %306  ;;  %v372_v31 = vmul.f32 %v345_v8, %v297_v52  ;;  %v382_v48 = vmul.f32 %v1682_v2, %v302_v6  ;;  %v1783_v15 = vmul.f32 %v1688_v7, %v302_v6  ;;  %v484_v18 = vadd.f32 %v460_v21, %v366_v55 }
  0xab   : > { %v384_v12 = vmul.f32 %v345_v8, %v307_v35  ;;  %v385_v42 = vmul.f32 %v349_v9, %v307_v35  ;;  %v386_v5 = vmul.f32 %v1676_v0, %v307_v35  ;;  %v1787_v50 = vmul.f32 %v1679_v1, %v307_v35 }
  0xac   : > { %2087 = vst [vmem:[#allocation16_spill] sm:$0xff] %v1783_v15  ;;  %v400_v30 = vpop.permute.xlu1 %399  ;;  %v491_v26 = vadd.f32 %v467_v44, %v373_v10  ;;  %v388_v4 = vmul.f32 %v1682_v2, %v307_v35  ;;  %v1791_v17 = vmul.f32 %v1688_v7, %v307_v35  ;;  %v603_v0 = vadd.f32 %v1710_v19, %v485_v40 }
  0xad   : > { %v473_v52 = vmul.f32 %v1673_v63, %v400_v30  ;;  %v474_v53 = vmul.f32 %v1650_v38, %v400_v30  ;;  %v472_v8 = vmul.f32 %v1684_v3, %v400_v30  ;;  %v490_v1 = vadd.f32 %v466_v45, %v372_v31 }
  0xae   : > { %2088 = vst [vmem:[#allocation17_spill] sm:$0xff] %v1791_v17  ;;  %v1796_v21 = vpop.permute.xlu0 %637  ;;  %v609_v9 = vadd.f32 %v585_v54, %v491_v26  ;;  %v475_v55 = vmul.f32 %v1652_v39, %v400_v30  ;;  %v476_v44 = vmul.f32 %v1656_v51, %v400_v30  ;;  %v1802_v2 = vmul.f32 %v1659_v56, %v400_v30 }
  0xaf   : > { %v1804_v7 = vadd.f32 %v474_v53, %v380_v34  ;;  %v602_v10 = vadd.f32 %v1714_v24, %v484_v18  ;;  %v608_v17 = vadd.f32 %v584_v37, %v490_v1  ;;  %v497_v15 = vadd.f32 %v473_v52, %v379_v32  ;;  %v2091_v52 = vld [vmem:[#allocation13_spill] sm:$0xff] }
  0xb0   : > { %v404_v6 = vpop.permute.xlu1 %403  ;;  %v1807_v35 = vadd.f32 %v1796_v21, %v609_v9  ;;  %v493_v54 = vadd.f32 %v1717_v25, %v375_v20  ;;  %v496_v26 = vadd.f32 %v472_v8, %v378_v11  ;;  %v1821_v24 = vadd.f32 %v476_v44, %v382_v48 }
  0xb1   : > { %v478_v19 = vmul.f32 %v1684_v3, %v404_v6  ;;  %v479_v31 = vmul.f32 %v1673_v63, %v404_v6  ;;  %v480_v45 = vmul.f32 %v1650_v38, %v404_v6  ;;  %v482_v30 = vmul.f32 %v1656_v51, %v404_v6  ;;  %v2092_v1 = vld [vmem:[#allocation15_spill] sm:$0xff] }
  0xb2   : > { %v1816_v34 = vmul.f32 0.01, %v1807_v35  ;;  %v1819_v40 = vadd.f32 %v1796_v21, %v608_v17  ;;  %v481_v32 = vmul.f32 %v1652_v39, %v404_v6  ;;  %v1825_v3 = vmul.f32 %v1659_v56, %v404_v6 }
  0xb3   : > { %v1827_v63 = vadd.f32 %v480_v45, %v386_v5  ;;  %v503_v38 = vadd.f32 %v479_v31, %v385_v42  ;;  %v615_v51 = vadd.f32 %v1727_v29, %v497_v15  ;;  %v502_v25 = vadd.f32 %v478_v19, %v384_v12 }
  0xb4   : > { %v680_v20 = vmul.f32 0.01, %v1819_v40  ;;  %v1831_v37 = vadd.f32 %v482_v30, %v388_v4  ;;  %v705_v48 = vmax.f32 %v1807_v35, %v1816_v34  ;;  %v611_v11 = vadd.f32 %v1753_v47, %v493_v54 }
  0xb5   : > { %v522_v18 = vpop.permute.xlu1 %521  ;;  %v495_v39 = vadd.f32 %v1721_v27, %v377_v23  ;;  %v614_v17 = vadd.f32 %v1724_v28, %v496_v26  ;;  %v605_v15 = vadd.f32 %v1699_v14, %v1767_v22  ;;  %v607_v23 = vadd.f32 %v1705_v16, %v1771_v41  ;;  %v2089_v16 = vld [vmem:[#allocation14_spill] sm:$0xff]  ;;  %v2090_v41 = vld [vmem:[#allocation8_spill] sm:$0xff] }
  0xb6   : > { %v596_v56 = vmul.f32 %v1669_v61, %v522_v18  ;;  %v597_v5 = vmul.f32 %v1671_v62, %v522_v18  ;;  %v1843_v29 = vmul.f32 %v1661_v57, %v522_v18  ;;  %v1846_v12 = vmul.f32 %v1663_v58, %v522_v18 }
  0xb7   : > { %v659_v42 = vadd.f32 %v1796_v21, %v611_v11  ;;  %v1852_v61 = vmul.f32 %v1665_v59, %v522_v18  ;;  %v1855_v62 = vmul.f32 %v1667_v60, %v522_v18  ;;  %v704_v27 = vmax.f32 %v1819_v40, %v680_v20 }
  0xb8   : > { %v613_v22 = vadd.f32 %v1759_v49, %v495_v39  ;;  %v621_v57 = vadd.f32 %v597_v5, %v503_v38  ;;  %v620_v14 = vadd.f32 %v596_v56, %v502_v25  ;;  %v604_v58 = vadd.f32 %v1696_v13, %v1750_v46 }
  0xb9   : > { %v683_v28 = vmul.f32 0.01, %v659_v42  ;;  %v610_v59 = vadd.f32 %v1746_v43, %v1773_v33  ;;  %v606_v60 = vadd.f32 %v2090_v41, %v2089_v16  ;;  %v612_v53 = vadd.f32 %v2091_v52, %v1779_v36 }
  0xba   : > { %v633_v47 = vpop.permute.xlu1 %632  ;;  %v661_v4 = vadd.f32 %v1796_v21, %v613_v22  ;;  %v499_v44 = vadd.f32 %v475_v55, %v2092_v1  ;;  %v505_v31 = vadd.f32 %v481_v32, %v1787_v50  ;;  %v2094_v22 = vld [vmem:[#allocation10_spill] sm:$0xff] }
  0xbb   : > { %v651_v8 = vadd.f32 %v633_v47, %v603_v0  ;;  %v650_v49 = vadd.f32 %v633_v47, %v602_v10  ;;  %v653_v9 = vadd.f32 %v633_v47, %v605_v15  ;;  %v655_v6 = vadd.f32 %v633_v47, %v607_v23  ;;  %v2093_v10 = vld [vmem:[#allocation16_spill] sm:$0xff] }
  0xbc   : > { %v685_v35 = vmul.f32 0.01, %v661_v4  ;;  %v1869_v13 = vadd.f32 %v633_v47, %v604_v58  ;;  %v1872_v46 = vadd.f32 %v1796_v21, %v610_v59  ;;  %v501_v54 = vadd.f32 %v1802_v2, %v2093_v10  ;;  %v2095_v59 = vld [vmem:[#allocation17_spill] sm:$0xff] }
  0xbd   : > { %v675_v19 = vmul.f32 0.01, %v651_v8  ;;  %v674_v33 = vmul.f32 0.01, %v650_v49  ;;  %v677_v43 = vmul.f32 0.01, %v653_v9  ;;  %v707_v50 = vmax.f32 %v659_v42, %v683_v28 }
  0xbe   : > { %v1875_v45 = vpop.permute.xlu1 %642  ;;  %v679_v36 = vmul.f32 0.01, %v655_v6  ;;  %v1878_v0 = vmul.f32 0.01, %v1869_v13  ;;  %v1881_v55 = vmul.f32 0.01, %v1872_v46  ;;  %v1887_v38 = vadd.f32 %v633_v47, %v606_v60 }
  0xbf   : > { %v699_v30 = vmax.f32 %v651_v8, %v675_v19  ;;  %v698_v34 = vmax.f32 %v650_v49, %v674_v33  ;;  %v663_v40 = vadd.f32 %v1875_v45, %v615_v51  ;;  %v662_v26 = vadd.f32 %v1875_v45, %v614_v17 }
  0xc0   : > { %v701_v20 = vmax.f32 %v653_v9, %v677_v43  ;;  %v703_v32 = vmax.f32 %v655_v6, %v679_v36  ;;  %v709_v39 = vmax.f32 %v661_v4, %v685_v35  ;;  %v700_v2 = vmax.f32 %v1869_v13, %v1878_v0 }
  0xc1   : > { %v1343_v25 = vpack.c.bf16 %v705_v48, %v699_v30  ;;  %v1345_v18 = vpack.c.bf16 %v704_v27, %v698_v34  ;;  %v687_v11 = vmul.f32 0.01, %v663_v40  ;;  %v686_v5 = vmul.f32 0.01, %v662_v26 }
  0xc2   : > { %v648_v56 = vpop.permute.xlu1 %647  ;;  %v1351_v15 = vpack.c.bf16 %v707_v50, %v701_v20  ;;  %v706_v51 = vmax.f32 %v1872_v46, %v1881_v55  ;;  %v1359_v42 = vpack.c.bf16 %v709_v39, %v703_v32  ;;  %v660_v23 = vadd.f32 %v1796_v21, %v612_v53  ;;  %v2096_v21 = vld [vmem:[#allocation12_spill] sm:$0xff]  ;;  %v2098_v55 = vld [vmem:[#allocation11_spill] sm:$0xff] }
  0xc3   : > { %1344 = vmatprep.subr.bf16.mxu0 %v1343_v25  ;;  %1367 = vmatprep.subr.bf16.mxu1 %v1343_v25  ;;  %v669_v17 = vadd.f32 %v648_v56, %v621_v57  ;;  %v711_v48 = vmax.f32 %v663_v40, %v687_v11  ;;  %v668_v27 = vadd.f32 %v648_v56, %v620_v14  ;;  %v678_v47 = vmul.f32 0.01, %v1887_v38 }
  0xc4   : > { %1346 = vmatpush1.bf16.msra.mxu0 %v1345_v18  ;;  %1369 = vmatpush1.bf16.msra.mxu1 %v1345_v18  ;;  %v617_v28 = vadd.f32 %v2094_v22, %v499_v44  ;;  %v623_v4 = vadd.f32 %v1846_v12, %v505_v31  ;;  %v507_v16 = vadd.f32 %v1825_v3, %v2095_v59  ;;  %v684_v8 = vmul.f32 0.01, %v660_v23  ;;  %v2097_v12 = vld [vmem:[#allocation9_spill] sm:$0xff] }
  0xc5   : > { %v693_v58 = vmul.f32 0.01, %v669_v17  ;;  %v692_v41 = vmul.f32 0.01, %v668_v27  ;;  %v710_v57 = vmax.f32 %v662_v26, %v686_v5  ;;  %v619_v52 = vadd.f32 %v2096_v21, %v501_v54 }
  0xc6   : > { %v665_v60 = vadd.f32 %v1875_v45, %v617_v28  ;;  %v671_v14 = vadd.f32 %v648_v56, %v623_v4  ;;  %v625_v49 = vadd.f32 %v1855_v62, %v507_v16  ;;  %v616_v6 = vadd.f32 %v2097_v12, %v1804_v7 }
  0xc7   : > { %v717_v53 = vmax.f32 %v669_v17, %v693_v58  ;;  %v716_v9 = vmax.f32 %v668_v27, %v692_v41  ;;  %v667_v44 = vadd.f32 %v1875_v45, %v619_v52  ;;  %v622_v46 = vadd.f32 %v1843_v29, %v1827_v63  ;;  %v722_v63 = vld [vmem:[%s2065_s3] sm:$0xff]  ;;  %v724_v29 = vld [vmem:[%s2065_s3 + $0x10] sm:$0xff]  ;;  %v1952_v27 = vpop.permute.xlu1 %737 }
  0xc8   : > { %v689_v1 = vmul.f32 0.01, %v665_v60  ;;  %v695_v3 = vmul.f32 0.01, %v671_v14  ;;  %v673_v13 = vadd.f32 %v648_v56, %v625_v49  ;;  %v702_v33 = vmax.f32 %v1887_v38, %v678_v47 }
  0xc9   : > { %v1347_v35 = vpack.c.bf16 %v717_v53, %v711_v48  ;;  %v1349_v19 = vpack.c.bf16 %v716_v9, %v710_v57  ;;  %v691_v43 = vmul.f32 0.01, %v667_v44  ;;  %v664_v31 = vadd.f32 %v1875_v45, %v616_v6 }
  0xca   : > { %v719_v62 = vmax.f32 %v671_v14, %v695_v3  ;;  %v697_v36 = vmul.f32 0.01, %v673_v13  ;;  %v670_v0 = vadd.f32 %v648_v56, %v622_v46  ;;  %v618_v7 = vadd.f32 %v2098_v55, %v1821_v24 }
  0xcb   : > { %1348 = vmatprep.subr.bf16.mxu0 %v1347_v35  ;;  %1368 = vmatprep.subr.bf16.mxu1 %v1347_v35  ;;  %v708_v10 = vmax.f32 %v660_v23, %v684_v8  ;;  %v713_v54 = vmax.f32 %v665_v60, %v689_v1  ;;  %v688_v30 = vmul.f32 0.01, %v664_v31  ;;  %v624_v34 = vadd.f32 %v1852_v61, %v1831_v37  ;;  %v723_v37 = vld [vmem:[%s2065_s3 + $0x8] sm:$0xff]  ;;  %v725_v61 = vld [vmem:[%s2065_s3 + $0x18] sm:$0xff]  ;;  %v1956_v28 = vpop.permute.xlu1 %747 }
  0xcc   : > { %1350 = vmatpush1.bf16.msra.mxu0 %v1349_v19  ;;  %1370 = vmatpush1.bf16.msra.mxu1 %v1349_v19  ;;  %v715_v40 = vmax.f32 %v667_v44, %v691_v43  ;;  %v721_v24 = vmax.f32 %v673_v13, %v697_v36  ;;  %v694_v26 = vmul.f32 0.01, %v670_v0  ;;  %v666_v20 = vadd.f32 %v1875_v45, %v618_v7 }
  0xcd   : > { %1352 = vmatprep.subr.bf16.mxu1 %v1351_v15  ;;  %1360 = vmatprep.subr.bf16.mxu0 %v1359_v42  ;;  %v1353_v50 = vpack.c.bf16 %v706_v51, %v700_v2  ;;  %v1361_v32 = vpack.c.bf16 %v708_v10, %v702_v33  ;;  %v672_v38 = vadd.f32 %v648_v56, %v624_v34  ;;  %v2099_v5 = vmov 0.0   ;;  %v733_v42 = vpop.permute.xlu0 %732 }
  0xce   : > { %v1355_v25 = vpack.c.bf16 %v719_v62, %v713_v54  ;;  %v1363_v18 = vpack.c.bf16 %v721_v24, %v715_v40  ;;  %v718_v11 = vmax.f32 %v670_v0, %v694_v26  ;;  %v690_v39 = vmul.f32 0.01, %v666_v20 }
  0xcf   : > { %1327 = vmatmul.mubr.msk.f32.vlgmr.msra.gmra.mrb[0].mxu0 %vm750_vm0, %v722_v63  ;;  %1329 = vmatmul.mubr.msk.f32.vlgmr.msra.gmra.mrb[0].mxu1 %vm750_vm0, %v724_v29  ;;  %v712_v45 = vmax.f32 %v664_v31, %v688_v30  ;;  %v696_v56 = vmul.f32 0.01, %v672_v38  ;;  %v1960_v52 = vpop.permute.xlu1 %1089  ;;  %v2100_v31 = vld [vmem:[#allocation7_spill] sm:$0xff] }
  0xd0   : > { %1354 = vmatpush1.bf16.msra.mxu1 %v1353_v50  ;;  %1362 = vmatpush1.bf16.msra.mxu0 %v1361_v32  ;;  %v714_v2 = vmax.f32 %v666_v20, %v690_v39 }
  0xd1   : > { %1356 = vmatprep.subr.bf16.mxu1 %v1355_v25  ;;  %1364 = vmatprep.subr.bf16.mxu0 %v1363_v18  ;;  %v1357_v15 = vpack.c.bf16 %v718_v11, %v712_v45  ;;  %v720_v51 = vmax.f32 %v672_v38, %v696_v56  ;;  %v1948_v23 = vpop.permute.xlu0 %742 }
  0xd2   : > { %833 = vmatprep.mubr.f32.mxu0 %v2099_v5  ;;  %845 = vmatprep.mubr.f32.mxu1 %v2099_v5 }
  0xd3   : > { %1328 = vmatmul.mubr.msk.f32.gmra.mrb[2].mxu0 %vm750_vm0, %v723_v37  ;;  %1330 = vmatmul.mubr.msk.f32.gmra.mrb[2].mxu1 %vm750_vm0, %v725_v61  ;;  %v1365_v17 = vpack.c.bf16 %v720_v51, %v714_v2  ;;  %v1972_v26 = vpop.permute.xlu1 %1099 }
  0xd4   : > { %1358 = vmatpush1.bf16.msra.mxu1 %v1357_v15  ;;  %916 = vmatprep.mubr.f32.mxu1 %v2099_v5 }
  0xd5   : > { %1005 = vmatprep.mubr.f32.mxu0 %v2099_v5  ;;  %1366 = vmatpush1.bf16.msra.mxu0 %v1365_v17  ;;  %v1950_v48 = vpop.permute.xlu0 %1084 }
  0xd7   : > { %1331 = vmatmul.mubr.msk.f32.vlgmr.msra.gmra.mrb[4].mxu1 %vm750_vm0, %v722_v63 }
  0xd8   : > { %922 = vmatprep.mubr.f32.mxu1 %v2099_v5  ;;  %1335 = vmatmul.mubr.msk.f32.vlgmr.msra.gmra.mrb[4].mxu0 %vm750_vm0, %v722_v63 }
  0xd9   : > { %1011 = vmatprep.mubr.f32.mxu0 %v2099_v5  ;;  %v1954_v22 = vpop.permute.xlu0 %1094 }
  0xdb   : > { %1332 = vmatmul.mubr.msk.f32.gmra.mrb[6].mxu1 %vm750_vm0, %v723_v37 }
  0xdc   : > { %928 = vmatprep.mubr.f32.mxu1 %v2099_v5  ;;  %1336 = vmatmul.mubr.msk.f32.gmra.mrb[6].mxu0 %vm750_vm0, %v723_v37 }
  0xdd   : > { %1017 = vmatprep.mubr.f32.mxu0 %v2099_v5  ;;  %v1184_v21 = vpop.permute.xlu0 %1183 }
  0xde   : > { %v1967_v62 = vrot.slane %v1184_v21, %v2100_v31 }
  0xdf   : > { %1333 = vmatmul.mubr.msk.f32.gmra.mrb[8].mxu1 %vm750_vm0, %v724_v29 }
  0xe0   : > { %934 = vmatprep.mubr.f32.mxu1 %v2099_v5  ;;  %1337 = vmatmul.mubr.msk.f32.gmra.mrb[8].mxu0 %vm750_vm0, %v724_v29 }
  0xe1   : > { %1023 = vmatprep.mubr.f32.mxu0 %v2099_v5 }
  0xe3   : > { %1334 = vmatmul.mubr.msk.f32.gmra.mrb[10].mxu1 %vm750_vm0, %v725_v61 }
  0xe4   : > { %1338 = vmatmul.mubr.msk.f32.gmra.mrb[10].mxu0 %vm750_vm0, %v725_v61 }
 0x1a2   : > { %v829_v58 = vpop.f32.mrb[0].mxu0  ;;  %v841_v47 = vpop.f32.mrb[0].mxu1 }
 0x1a3   : > { %v830_v4 = vadd.f32 %v829_v58, %v733_v42  ;;  %v842_v59 = vadd.f32 %v841_v47, %v1948_v23  ;;  %v831_v16 = vpop.f32.mrb[1].mxu0  ;;  %v843_v41 = vpop.f32.mrb[1].mxu1 }
 0x1a4   : > { %v832_v57 = vadd.f32 %v831_v16, %v733_v42  ;;  %v844_v60 = vadd.f32 %v843_v41, %v1948_v23 }
 0x1a5   : > { %v1030_v53 = vmul.f32 0.01, %v830_v4  ;;  %v1042_v8 = vmul.f32 0.01, %v842_v59 }
 0x1a6   : > { %v1031_v14 = vmul.f32 0.01, %v832_v57  ;;  %v1043_v49 = vmul.f32 0.01, %v844_v60  ;;  %v835_v9 = vpop.f32.mrb[2].mxu0  ;;  %v847_v1 = vpop.f32.mrb[2].mxu1 }
 0x1a7   : > { %v1054_v44 = vmax.f32 %v830_v4, %v1030_v53  ;;  %v1066_v12 = vmax.f32 %v842_v59, %v1042_v8  ;;  %v836_v6 = vadd.f32 %v835_v9, %v1952_v27  ;;  %v848_v35 = vadd.f32 %v847_v1, %v1956_v28  ;;  %v837_v3 = vpop.f32.mrb[3].mxu0  ;;  %v849_v13 = vpop.f32.mrb[3].mxu1 }
 0x1a8   : > { %v1055_v46 = vmax.f32 %v832_v57, %v1031_v14  ;;  %v1067_v19 = vmax.f32 %v844_v60, %v1043_v49  ;;  %v838_v33 = vadd.f32 %v837_v3, %v1952_v27  ;;  %v850_v43 = vadd.f32 %v849_v13, %v1956_v28 }
 0x1a9   : > { %v1036_v36 = vmul.f32 0.01, %v836_v6  ;;  %v1048_v0 = vmul.f32 0.01, %v848_v35  ;;  %v1102_v55 = vmul.f32 %v1950_v48, %v1054_v44  ;;  %v1114_v7 = vmul.f32 %v1954_v22, %v1066_v12 }
 0x1aa   : > { %v1037_v63 = vmul.f32 0.01, %v838_v33  ;;  %v1049_v29 = vmul.f32 0.01, %v850_v43  ;;  %v918_v10 = vpop.f32.mrb[4].mxu1  ;;  %v1103_v54 = vmul.f32 %v1950_v48, %v1055_v46  ;;  %v1115_v20 = vmul.f32 %v1954_v22, %v1067_v19 }
 0x1ab   : > { %v1060_v30 = vmax.f32 %v836_v6, %v1036_v36  ;;  %v1072_v34 = vmax.f32 %v848_v35, %v1048_v0  ;;  %v919_v40 = vadd.f32 %v918_v10, %v733_v42  ;;  %v920_v24 = vpop.f32.mrb[5].mxu1  ;;  %v1007_v38 = vpop.f32.mrb[4].mxu0 }
 0x1ac   : > { %v1061_v50 = vmax.f32 %v838_v33, %v1037_v63  ;;  %v1073_v32 = vmax.f32 %v850_v43, %v1049_v29  ;;  %v921_v25 = vadd.f32 %v920_v24, %v733_v42  ;;  %v1008_v37 = vadd.f32 %v1007_v38, %v733_v42  ;;  %v1009_v61 = vpop.f32.mrb[5].mxu0 }
 0x1ad   : > { %v1108_v18 = vmul.f32 %v1960_v52, %v1060_v30  ;;  %v1120_v11 = vmul.f32 %v1972_v26, %v1072_v34  ;;  %v1032_v39 = vmul.f32 0.01, %v919_v40  ;;  %v1010_v15 = vadd.f32 %v1009_v61, %v733_v42 }
 0x1ae   : > { %v1109_v45 = vmul.f32 %v1960_v52, %v1061_v50  ;;  %v1121_v56 = vmul.f32 %v1972_v26, %v1073_v32  ;;  %v1033_v5 = vmul.f32 0.01, %v921_v25  ;;  %v924_v2 = vpop.f32.mrb[6].mxu1  ;;  %v1034_v58 = vmul.f32 0.01, %v1008_v37 }
 0x1af   : > { %v1126_v51 = vadd.f32 %v1108_v18, %v1102_v55  ;;  %v1056_v17 = vmax.f32 %v919_v40, %v1032_v39  ;;  %v925_v47 = vadd.f32 %v924_v2, %v1952_v27  ;;  %v926_v4 = vpop.f32.mrb[7].mxu1  ;;  %v1035_v41 = vmul.f32 0.01, %v1010_v15  ;;  %v1013_v57 = vpop.f32.mrb[6].mxu0 }
 0x1b0   : > { %v1135_v59 = vadd.f32 %v1109_v45, %v1103_v54  ;;  %v1057_v16 = vmax.f32 %v921_v25, %v1033_v5  ;;  %v927_v60 = vadd.f32 %v926_v4, %v1952_v27  ;;  %v1058_v8 = vmax.f32 %v1008_v37, %v1034_v58  ;;  %v1015_v49 = vpop.f32.mrb[7].mxu0 }
 0x1b1   : > { %v1127_v21 = vadd.f32 %v1126_v51, %v1114_v7  ;;  %v1104_v53 = vmul.f32 %v1950_v48, %v1056_v17  ;;  %v1038_v14 = vmul.f32 0.01, %v925_v47  ;;  %v1059_v1 = vmax.f32 %v1010_v15, %v1035_v41 }
 0x1b2   : > { %v1136_v42 = vadd.f32 %v1135_v59, %v1115_v20  ;;  %v1105_v9 = vmul.f32 %v1950_v48, %v1057_v16  ;;  %v1014_v44 = vadd.f32 %v1013_v57, %v1952_v27  ;;  %v930_v12 = vpop.f32.mrb[8].mxu1  ;;  %v1106_v35 = vmul.f32 %v1950_v48, %v1058_v8 }
 0x1b3   : > { %v1128_v6 = vadd.f32 %v1127_v21, %v1120_v11  ;;  %v1062_v3 = vmax.f32 %v925_v47, %v1038_v14  ;;  %v1039_v13 = vmul.f32 0.01, %v927_v60  ;;  %v932_v46 = vpop.f32.mrb[9].mxu1  ;;  %v1107_v33 = vmul.f32 %v1950_v48, %v1059_v1  ;;  %v1019_v36 = vpop.f32.mrb[8].mxu0 }
 0x1b4   : > { %v1137_v19 = vadd.f32 %v1136_v42, %v1121_v56  ;;  %v1040_v43 = vmul.f32 0.01, %v1014_v44  ;;  %v1016_v31 = vadd.f32 %v1015_v49, %v1952_v27  ;;  %v931_v63 = vadd.f32 %v930_v12, %v1948_v23  ;;  %v1021_v29 = vpop.f32.mrb[9].mxu0 }
 0x1b5   : > { %v1129_v0 = vrot.slane %v1128_v6, 4  ;;  %v1110_v55 = vmul.f32 %v1960_v52, %v1062_v3  ;;  %v1063_v7 = vmax.f32 %v927_v60, %v1039_v13  ;;  %v1020_v34 = vadd.f32 %v1019_v36, %v1948_v23 }
 0x1b6   : > { %v1138_v10 = vrot.slane %v1137_v19, 4  ;;  %v1064_v54 = vmax.f32 %v1014_v44, %v1040_v43  ;;  %v1041_v30 = vmul.f32 0.01, %v1016_v31  ;;  %v936_v40 = vpop.f32.mrb[10].mxu1  ;;  %v1044_v50 = vmul.f32 0.01, %v931_v63 }
 0x1b7   : > { %v1130_v24 = vadd.f32 %v1129_v0, %v1128_v6  ;;  %v1144_v20 = vadd.f32 %v1110_v55, %v1104_v53  ;;  %v1111_v48 = vmul.f32 %v1960_v52, %v1063_v7  ;;  %v938_v27 = vpop.f32.mrb[11].mxu1  ;;  %v1046_v18 = vmul.f32 0.01, %v1020_v34  ;;  %v1025_v11 = vpop.f32.mrb[10].mxu0 }
 0x1b8   : > { %v1139_v32 = vadd.f32 %v1138_v10, %v1137_v19  ;;  %v1112_v38 = vmul.f32 %v1960_v52, %v1064_v54  ;;  %v1065_v25 = vmax.f32 %v1016_v31, %v1041_v30  ;;  %v1068_v61 = vmax.f32 %v931_v63, %v1044_v50  ;;  %v1027_v56 = vpop.f32.mrb[11].mxu0 }
 0x1b9   : > { %v1131_v39 = vrot.slane %v1130_v24, 2  ;;  %v1153_v37 = vadd.f32 %v1111_v48, %v1105_v9  ;;  %v933_v45 = vadd.f32 %v932_v46, %v1948_v23  ;;  %v1070_v51 = vmax.f32 %v1020_v34, %v1046_v18 }
 0x1ba   : > { %v1140_v5 = vrot.slane %v1139_v32, 2  ;;  %v1162_v15 = vadd.f32 %v1112_v38, %v1106_v35  ;;  %v1113_v2 = vmul.f32 %v1960_v52, %v1065_v25  ;;  %v1116_v58 = vmul.f32 %v1954_v22, %v1068_v61 }
 0x1bb   : > { %v1132_v17 = vadd.f32 %v1131_v39, %v1130_v24  ;;  %v1045_v47 = vmul.f32 0.01, %v933_v45  ;;  %v1022_v4 = vadd.f32 %v1021_v29, %v1948_v23  ;;  %v1118_v41 = vmul.f32 %v1954_v22, %v1070_v51 }
 0x1bc   : > { %v1141_v59 = vadd.f32 %v1140_v5, %v1139_v32  ;;  %v1171_v16 = vadd.f32 %v1113_v2, %v1107_v33  ;;  %v937_v57 = vadd.f32 %v936_v40, %v1956_v28  ;;  %v1145_v21 = vadd.f32 %v1144_v20, %v1116_v58 }
 0x1bd   : > { %v1133_v60 = vrot.slane %v1132_v17, 1  ;;  %v1069_v53 = vmax.f32 %v933_v45, %v1045_v47  ;;  %v1047_v8 = vmul.f32 0.01, %v1022_v4  ;;  %v1163_v49 = vadd.f32 %v1162_v15, %v1118_v41 }
 0x1be   : > { %v1142_v14 = vrot.slane %v1141_v59, 1  ;;  %v1050_v52 = vmul.f32 0.01, %v937_v57  ;;  %v1026_v42 = vadd.f32 %v1025_v11, %v1956_v28  ;;  %v939_v23 = vadd.f32 %v938_v27, %v1956_v28 }
 0x1bf   : > { %v1134_v9 = vadd.f32 %v1133_v60, %v1132_v17  ;;  %v1117_v1 = vmul.f32 %v1954_v22, %v1069_v53  ;;  %v1071_v44 = vmax.f32 %v1022_v4, %v1047_v8  ;;  %v1028_v3 = vadd.f32 %v1027_v56, %v1956_v28  ;;  %v2101_v53 = vld [vmem:[#allocation6_spill] sm:$0xff] }
 0x1c0   : > { %v1143_v12 = vadd.f32 %v1142_v14, %v1141_v59  ;;  %v1074_v6 = vmax.f32 %v937_v57, %v1050_v52  ;;  %v1052_v35 = vmul.f32 0.01, %v1026_v42  ;;  %v1051_v33 = vmul.f32 0.01, %v939_v23 }
 0x1c1   : > { %v1190_v13 = vadd.f32 %v1967_v62, %v1134_v9  ;;  %v1154_v46 = vadd.f32 %v1153_v37, %v1117_v1  ;;  %v1119_v19 = vmul.f32 %v1954_v22, %v1071_v44  ;;  %v1053_v0 = vmul.f32 0.01, %v1028_v3 }
 0x1c2   : > { %v1191_v43 = vadd.f32 %v1967_v62, %v1143_v12  ;;  %v1122_v31 = vmul.f32 %v1972_v26, %v1074_v6  ;;  %v1076_v36 = vmax.f32 %v1026_v42, %v1052_v35  ;;  %v1075_v7 = vmax.f32 %v939_v23, %v1051_v33 }
 0x1c3   : > { %v1172_v55 = vadd.f32 %v1171_v16, %v1119_v19  ;;  %v1077_v10 = vmax.f32 %v1028_v3, %v1053_v0  ;;  %v1492_v61 = vmov 1966171168   ;;  %v2102_v6 = vlaneseq }
 0x1c4   : > { %v1146_v63 = vadd.f32 %v1145_v21, %v1122_v31  ;;  %v1124_v29 = vmul.f32 %v1972_v26, %v1076_v36  ;;  %v1202_v54 = vcombine.low %v1190_v13, %v1191_v43  ;;  %v1123_v28 = vmul.f32 %v1972_v26, %v1075_v7 }
 0x1c5   : > { %v1125_v22 = vmul.f32 %v1972_v26, %v1077_v10  ;;  %v1206_v45 = vunpack.c.l.s4 %v1492_v61  ;;  %vm1245_vm1 = vcmp.lt.s32.totalorder %v2102_v6, 768 }
 0x1c6   : > { %v1147_v30 = vrot.slane %v1146_v63, 4  ;;  %v1164_v34 = vadd.f32 %v1163_v49, %v1124_v29  ;;  %v1155_v40 = vadd.f32 %v1154_v46, %v1123_v28 }
 0x1c7   : > { %v1173_v48 = vadd.f32 %v1172_v55, %v1125_v22  ;;  %v1207_v47 = vunpack.c.0.s8 %v1206_v45 }
 0x1c8   : > { %v1148_v24 = vadd.f32 %v1147_v30, %v1146_v63  ;;  %v1165_v20 = vrot.slane %v1164_v34, 4  ;;  %v1156_v50 = vrot.slane %v1155_v40, 4 }
 0x1c9   : > { %v1174_v38 = vrot.slane %v1173_v48, 4  ;;  %v1210_v8 = vsub.s32 %v1207_v47, %v2101_v53 }
 0x1ca   : > { %v1149_v27 = vrot.slane %v1148_v24, 2  ;;  %v1166_v32 = vadd.f32 %v1165_v20, %v1164_v34  ;;  %v1157_v25 = vadd.f32 %v1156_v50, %v1155_v40 }
 0x1cb   : > { %v1175_v39 = vadd.f32 %v1174_v38, %v1173_v48  ;;  %v1211_v42 = vrot.slane %v1202_v54, %v1210_v8 }
 0x1cc   : > { %v1150_v18 = vadd.f32 %v1149_v27, %v1148_v24  ;;  %v1167_v11 = vrot.slane %v1166_v32, 2  ;;  %v1158_v37 = vrot.slane %v1157_v25, 2 }
 0x1cd   : > { %v1176_v15 = vrot.slane %v1175_v39, 2 }
 0x1ce   : > { %v1151_v56 = vrot.slane %v1150_v18, 1  ;;  %v1168_v5 = vadd.f32 %v1167_v11, %v1166_v32  ;;  %v1159_v26 = vadd.f32 %v1158_v37, %v1157_v25 }
 0x1cf   : > { %v1177_v17 = vadd.f32 %v1176_v15, %v1175_v39 }
 0x1d0   : > { %v1152_v2 = vadd.f32 %v1151_v56, %v1150_v18  ;;  %v1169_v51 = vrot.slane %v1168_v5, 1  ;;  %v1160_v58 = vrot.slane %v1159_v26, 1 }
 0x1d1   : > { %v1178_v59 = vrot.slane %v1177_v17, 1 }
 0x1d2   : > { %v1170_v4 = vadd.f32 %v1169_v51, %v1168_v5  ;;  %v1192_v16 = vadd.f32 %v1967_v62, %v1152_v2  ;;  %v1161_v41 = vadd.f32 %v1160_v58, %v1159_v26 }
 0x1d3   : > { %v1179_v60 = vadd.f32 %v1178_v59, %v1177_v17 }
 0x1d4   : > { %v1194_v57 = vadd.f32 %v1967_v62, %v1170_v4  ;;  %v1193_v21 = vadd.f32 %v1967_v62, %v1161_v41 }
 0x1d5   : > { %v1195_v14 = vadd.f32 %v1967_v62, %v1179_v60 }
 0x1d6   : > { %v1203_v49 = vcombine.low %v1192_v16, %v1193_v21 }
 0x1d7   : > { %v1204_v52 = vcombine.low %v1194_v57, %v1195_v14 }
 0x1d8   : > { %v1218_v9 = vrot.slane %v1203_v49, %v1210_v8 }
 0x1d9   : > { %v1225_v1 = vrot.slane %v1204_v52, %v1210_v8 }
 0x1da   : > { %v1226_v44 = vcombine.low %v1211_v42, %v1218_v9 }
 0x1db   : > { %v1240_v12 = vrot.slane %v1225_v1, %v1210_v8 }
 0x1dc   : > { %v1233_v23 = vrot.slane %v1226_v44, %v1210_v8 }
 0x1de   : > { %v1241_v35 = vcombine.low %v1233_v23, %v1240_v12 }
 0x1e0   : > { %1247 = vst.msk [vmem:[%s274_s17] sm:$0x3f] %vm1245_vm1, %v1241_v35 }
 0x1e1   : > { %1437 = shalt.err (!%p1434_p3)
}
 0x1e2   : > { %s1438_s30 = scalar_lea.hbm %s2020_s21, 96  ;;  %s1442_s14 = scalar_lea.hbm %s2069_s7, 384 }
 0x1e3   : > { %p1439_p4 = scmp.ne.s32.totalorder %s2020_s21, %s1438_s30  ;;  %p1443_p9 = scmp.lt.u32.totalorder %s2020_s21, %s2069_s7 }
 0x1e4   : > { %p1444_p10 = scmp.lt.u32.totalorder %s1442_s14, %s1438_s30  ;;  %p1446_p12 = scmp.lt.u32.totalorder %s1438_s30, %s2020_s21 }
 0x1e5   : > { %p1440_p7 = pnand %p1439_p4, %p1575_p5 }
 0x1e6   : > { %p1445_p11 = por %p1444_p10, %p1443_p9 }
 0x1e7   : > { %p1441_p8 = pneg %p1440_p7 }
 0x1e8   : > { %p1447_p13 = por %p1446_p12, %p1445_p11 }
 0x1ea   : > { %p1448_p0 = pnand %p1447_p13, %p1441_p8 }
 0x1ec   : > { %1451 = shalt.err (!%p1448_p0)
}
 0x1ed   : > { %1372 = dma.vmem_to_hbm [thread:$0]  (%p1575_p5), %s2022_s18, 96, %s2020_s21, %s1249_s22  }
 0x1ee PF: > { %p1378_p1 = scmp.ge.s32.totalorder %s1486_s29, 2  ;;  %s1275_s17 = sand.u32 1, %s1474_s26  }
 0x1ef   : > { %s1276_s19 = scalar_lea.sflag [#allocation4], %s1275_s17 }
 0x1f0   : > { %p1375_p2 = pnand %p1378_p1, %p1579_p6 }
 0x1f2   : > { %1469 = dma.done.wait (!%p1375_p2), %s1276_s19, 96  }
 0x1f3   : > { %1471 = vsyncadd (!%p1375_p2), %s1276_s19, 4294967200  ;;  %p19_p3 = scmp.ge.s32.totalorder %s1562_s8, 6   ;;  %s2103_s26 = smov %s1478_s27 }
 0x1f4   : > { %s2104_s27 = smov %s1482_s28  ;;  %s2105_s28 = smov %s1573_s11 }
 0x1f5   : > { %s2106_s29 = smov %s1562_s8  ;;  %21 = sbr.rel (!%p19_p3) target bundleno = 6 (0x6), region = 83 }
 0x1fc   :  { %1281 = vsyncpa [#allocation4], 1 }
 0x1fd   :  { %1283 = vsyncpa [#allocation4 + $0x1], 1 }

</bundles_post_ra>
